<compile_context>
chip_gen: v5e
topology: v5e:2x2
jax: 0.10.0
libtpu: 0.0.40
codegen_flags: <defaults>
</compile_context>

<pallas_src>
import jax
import jax.numpy as jnp
from jax.experimental import pallas as pl
from jax.experimental.pallas import tpu as pltpu


def _round_up(n: int, m: int) -> int:
    return ((n + m - 1) // m) * m


def _qnet_kernel(x_ref, w1_ref, b1_ref, w2_ref, b2_ref, o_ref):
    # hidden = relu(x @ w1 + b1): MXU accumulates in f32, bias-add/ReLU stay
    # f32 on the VPU (important on v5e, which has no bf16 VPU path); only the
    # final store casts to the output dtype.
    h = jnp.dot(x_ref[...], w1_ref[...], preferred_element_type=jnp.float32)
    h = jnp.maximum(h + b1_ref[...].astype(jnp.float32), 0.0)
    # out = hidden @ w2 + b2 -- stored at its logical (narrow) width.
    y = jnp.dot(h, w2_ref[...].astype(jnp.float32),
                preferred_element_type=jnp.float32)
    o_ref[...] = (y + b2_ref[...].astype(jnp.float32)).astype(o_ref.dtype)


_TB_MAX = 2048  # rows per batch tile; 2048*11*4 B double-buffered << any VMEM budget


def linear_qnet_forward(x, w1, b1, w2, b2):
    """Pallas forward pass: relu(x @ w1 + b1) @ w2 + b2.

    No wrapper padding: all blocks either match the full array dims or are
    8-aligned on the sublane axis; partial edge blocks are auto-masked.
    """
    B, K = x.shape
    H = w1.shape[1]
    O = w2.shape[1]
    out_dtype = x.dtype

    b1 = b1.reshape(1, H)
    b2 = b2.reshape(1, O)

    if B <= _TB_MAX:
        # Single tile: block dims equal the full array dims -> no padding, no
        # masking, grid of length 1.
        TB = B
        grid = (1,)
    else:
        # Multi-tile: round the tile count up to an even number so the
        # "parallel" batch axis balances across v7x's two TensorCores.
        n_tiles = pl.cdiv(B, _TB_MAX)
        n_tiles += n_tiles % 2
        TB = _round_up(pl.cdiv(B, n_tiles), 8)
        grid = (pl.cdiv(B, TB),)

    # Logical (unpadded) work / traffic, per-operand itemsizes.
    cost = pl.CostEstimate(
        flops=2 * B * (K * H + H * O),
        transcendentals=0,
        bytes_accessed=(x.size * x.dtype.itemsize
                        + w1.size * w1.dtype.itemsize
                        + b1.size * b1.dtype.itemsize
                        + w2.size * w2.dtype.itemsize
                        + b2.size * b2.dtype.itemsize
                        + B * O * jnp.dtype(out_dtype).itemsize),
    )

    return pl.pallas_call(
        _qnet_kernel,
        out_shape=jax.ShapeDtypeStruct((B, O), out_dtype),
        grid_spec=pltpu.PrefetchScalarGridSpec(
            num_scalar_prefetch=0,
            grid=grid,
            in_specs=[
                # x: streamed per batch tile (last dim == full K -> legal).
                pl.BlockSpec((TB, K), lambda i: (i, 0)),
                # Weights / biases: constant index_map -> fetched once and
                # kept VMEM-resident across all batch tiles.
                pl.BlockSpec((K, H), lambda i: (0, 0)),
                pl.BlockSpec((1, H), lambda i: (0, 0)),
                pl.BlockSpec((H, O), lambda i: (0, 0)),
                pl.BlockSpec((1, O), lambda i: (0, 0)),
            ],
            # Output block last dim equals the full array last dim (O=3).
            out_specs=pl.BlockSpec((TB, O), lambda i: (i, 0)),
        ),
        compiler_params=pltpu.CompilerParams(
            # Batch tiles are independent -> shard across the 2 TCs on v7x.
            dimension_semantics=("parallel",),
        ),
        cost_estimate=cost,
    )(x, w1, b1, w2, b2)


def init_params(key, input_size, hidden_size, output_size):
    """Deterministic init mimicking PyTorch nn.Linear default (uniform +/- 1/sqrt(fan_in))."""
    k1, k2, k3, k4 = jax.random.split(key, 4)
    bound1 = 1.0 / jnp.sqrt(input_size)
    bound2 = 1.0 / jnp.sqrt(hidden_size)
    w1 = jax.random.uniform(k1, (input_size, hidden_size), jnp.float32, -bound1, bound1)
    b1 = jax.random.uniform(k2, (1, hidden_size), jnp.float32, -bound1, bound1)
    w2 = jax.random.uniform(k3, (hidden_size, output_size), jnp.float32, -bound2, bound2)
    b2 = jax.random.uniform(k4, (1, output_size), jnp.float32, -bound2, bound2)
    return w1, b1, w2, b2


def _reference(x, w1, b1, w2, b2):
    return jnp.maximum(x @ w1 + b1, 0.0) @ w2 + b2


if __name__ == "__main__":
    # Classic snake-game Q-net sizes: input=11, hidden=32, output=3.
    input_size, hidden_size, output_size = 11, 32, 3

    key = jax.random.PRNGKey(0)
    kx, kp, kx2 = jax.random.split(key, 3)
    w1, b1, w2, b2 = init_params(kp, input_size, hidden_size, output_size)

    # Small per-step-inference shape (batch=2) -> single-tile fast path.
    x_small = jax.random.normal(kx, (2, input_size), jnp.float32)
    out_small = jax.block_until_ready(linear_qnet_forward(x_small, w1, b1, w2, b2))
    ref_small = _reference(x_small, w1, b1, w2, b2)
    assert out_small.shape == (2, output_size)
    assert jnp.allclose(out_small, ref_small, atol=1e-5, rtol=1e-5)

    # Replay-buffer-style batch -> exercises the multi-tile (grid>1) path with
    # a partial, auto-masked last block.
    x_big = jax.random.normal(kx2, (4100, input_size), jnp.float32)
    out_big = jax.block_until_ready(linear_qnet_forward(x_big, w1, b1, w2, b2))
    ref_big = _reference(x_big, w1, b1, w2, b2)
    assert out_big.shape == (4100, output_size)
    assert jnp.allclose(out_big, ref_big, atol=1e-4, rtol=1e-4)

    print("KERNEL_OK")
</pallas_src>

<mosaic_0001>
module attributes {stable_mosaic.version = 11 : i64} {
  func.func @_qnet_kernel(%arg0: i32, %arg1: memref<2x11xf32, #tpu.memory_space<vmem>>, %arg2: memref<11x32xf32, #tpu.memory_space<vmem>>, %arg3: memref<1x32xf32, #tpu.memory_space<vmem>>, %arg4: memref<32x3xf32, #tpu.memory_space<vmem>>, %arg5: memref<1x3xf32, #tpu.memory_space<vmem>>, %arg6: memref<2x3xf32, #tpu.memory_space<vmem>>) attributes {dimension_semantics = [#tpu.dimension_semantics<parallel>], iteration_bounds = array<i64: 1>, scalar_prefetch = 0 : i64, scratch_operands = 0 : i64, tpu.core_type = #tpu.core_type<tc>, window_params = [{transform_indices = @transform_0, window_bounds = array<i64: 2, 11>}, {pipeline_mode = #tpu.pipeline_mode<synchronous>, transform_indices = @transform_1, window_bounds = array<i64: 11, 32>}, {pipeline_mode = #tpu.pipeline_mode<synchronous>, transform_indices = @transform_2, window_bounds = array<i64: 1, 32>}, {pipeline_mode = #tpu.pipeline_mode<synchronous>, transform_indices = @transform_3, window_bounds = array<i64: 32, 3>}, {pipeline_mode = #tpu.pipeline_mode<synchronous>, transform_indices = @transform_4, window_bounds = array<i64: 1, 3>}, {transform_indices = @transform_5, window_bounds = array<i64: 2, 3>}]} {
    %c0 = arith.constant 0 : index
    %c0_0 = arith.constant 0 : index
    %0 = vector.load %arg1[%c0, %c0_0] : memref<2x11xf32, #tpu.memory_space<vmem>>, vector<2x11xf32>
    %c0_1 = arith.constant 0 : index
    %c0_2 = arith.constant 0 : index
    %1 = vector.load %arg2[%c0_1, %c0_2] : memref<11x32xf32, #tpu.memory_space<vmem>>, vector<11x32xf32>
    %cst = arith.constant dense<0.000000e+00> : vector<2x32xf32>
    %2 = tpu.matmul %0, %1, %cst {dimension_numbers = #tpu.dot_dimension_numbers<[1], [0], [0], [1], [0, 0, 1, 1], [], []>} : vector<2x11xf32>, vector<11x32xf32>, vector<2x32xf32> -> vector<2x32xf32>
    %c0_3 = arith.constant 0 : index
    %c0_4 = arith.constant 0 : index
    %3 = vector.load %arg3[%c0_3, %c0_4] : memref<1x32xf32, #tpu.memory_space<vmem>>, vector<1x32xf32>
    %4 = vector.broadcast %3 : vector<1x32xf32> to vector<2x32xf32>
    %5 = arith.addf %2, %4 : vector<2x32xf32>
    %cst_5 = arith.constant 0.000000e+00 : f32
    %6 = vector.broadcast %cst_5 : f32 to vector<2x32xf32>
    %7 = arith.maximumf %5, %6 : vector<2x32xf32>
    %c0_6 = arith.constant 0 : index
    %c0_7 = arith.constant 0 : index
    %8 = vector.load %arg4[%c0_6, %c0_7] : memref<32x3xf32, #tpu.memory_space<vmem>>, vector<32x3xf32>
    %cst_8 = arith.constant dense<0.000000e+00> : vector<2x3xf32>
    %9 = tpu.matmul %7, %8, %cst_8 {dimension_numbers = #tpu.dot_dimension_numbers<[1], [0], [0], [1], [0, 0, 1, 1], [], []>} : vector<2x32xf32>, vector<32x3xf32>, vector<2x3xf32> -> vector<2x3xf32>
    %c0_9 = arith.constant 0 : index
    %c0_10 = arith.constant 0 : index
    %10 = vector.load %arg5[%c0_9, %c0_10] : memref<1x3xf32, #tpu.memory_space<vmem>>, vector<1x3xf32>
    %11 = vector.broadcast %10 : vector<1x3xf32> to vector<2x3xf32>
    %12 = arith.addf %9, %11 : vector<2x3xf32>
    %c0_11 = arith.constant 0 : index
    %c0_12 = arith.constant 0 : index
    %13 = vector.load %arg6[%c0_11, %c0_12] : memref<2x3xf32, #tpu.memory_space<vmem>>, vector<2x3xf32>
    tpu.vector_store %arg6[%c0_11, %c0_12], %12 {strides = array<i32>} : memref<2x3xf32, #tpu.memory_space<vmem>>, vector<2x3xf32>,
    return
  }
  func.func @transform_0(%arg0: i32) -> (i32, i32) {
    %c0_i32 = arith.constant 0 : i32
    %c0_i32_0 = arith.constant 0 : i32
    return %arg0, %c0_i32 : i32, i32
  }
  func.func @transform_1(%arg0: i32) -> (i32, i32) {
    %c0_i32 = arith.constant 0 : i32
    %c0_i32_0 = arith.constant 0 : i32
    %c0_i32_1 = arith.constant 0 : i32
    return %c0_i32, %c0_i32_0 : i32, i32
  }
  func.func @transform_2(%arg0: i32) -> (i32, i32) {
    %c0_i32 = arith.constant 0 : i32
    %c0_i32_0 = arith.constant 0 : i32
    %c0_i32_1 = arith.constant 0 : i32
    return %c0_i32, %c0_i32_0 : i32, i32
  }
  func.func @transform_3(%arg0: i32) -> (i32, i32) {
    %c0_i32 = arith.constant 0 : i32
    %c0_i32_0 = arith.constant 0 : i32
    %c0_i32_1 = arith.constant 0 : i32
    return %c0_i32, %c0_i32_0 : i32, i32
  }
  func.func @transform_4(%arg0: i32) -> (i32, i32) {
    %c0_i32 = arith.constant 0 : i32
    %c0_i32_0 = arith.constant 0 : i32
    %c0_i32_1 = arith.constant 0 : i32
    return %c0_i32, %c0_i32_0 : i32, i32
  }
  func.func @transform_5(%arg0: i32) -> (i32, i32) {
    %c0_i32 = arith.constant 0 : i32
    %c0_i32_0 = arith.constant 0 : i32
    return %arg0, %c0_i32 : i32, i32
  }
}

</mosaic_0001>

<bundles_post_ra>
// kernel: tpu_custom_call.1
= control target key start
LH: loop header
LB: loop body
LE: loop exit
PB: predicated region body
PF: predicated region fallthrough
CT: control target
= control target key end

     0   :  { %vm32_vm0 = vcmask 1042432   ;;  %vm28_vm1 = vcmask 89088   ;;  %s200_s0 = inlined_call_operand.vmem [shape: f32[2,11], index: 0, kind: input, shape index: {}]   ;;  %s201_s1 = inlined_call_operand.vmem [shape: f32[11,32], index: 1, kind: input, shape index: {}]   ;;  %s202_s2 = inlined_call_operand.vmem [shape: f32[1,32], index: 2, kind: input, shape index: {}]   ;;  %s203_s3 = inlined_call_operand.vmem [shape: f32[32,3], index: 3, kind: input, shape index: {}]   ;;  %s204_s4 = inlined_call_operand.vmem [shape: f32[1,3], index: 4, kind: input, shape index: {}]   ;;  %s205_s5 = inlined_call_operand.hbm [shape: f32[2,3], index: 5, kind: output, shape index: {}]  }
   0x1   :  { %v23_v0 = vld [vmem:[%s201_s1 + $0x8] sm:$0x7]  ;;  %v22_v1 = vld [vmem:[%s201_s1] sm:$0xff]  ;;  %v60_v3 = vld [vmem:[%s203_s3 + $0x18] sm:$0xff] }
   0x2   :  { %107 = vmatpush.msk.msra.mxu0 %vm32_vm0, %v23_v0  ;;  %v21_v2 = vld [vmem:[%s200_s0] sm:$0x3]  ;;  %81 = vmatpush.msra.mxu1 %v60_v3 }
   0x3   :  { %10 = vsyncpa [#allocation3], 0  ;;  %v59_v4 = vld [vmem:[%s203_s3 + $0x10] sm:$0xff]  ;;  %v58_v5 = vld [vmem:[%s203_s3 + $0x8] sm:$0xff]  ;;  %vm65_vm2 = vcmask 261120   ;;  %s139_s9 = smov [#allocation2]  }
   0x4   :  { %51 = vmatpush.msra.mxu0 %v22_v1  ;;  %82 = vmatpush.msra.mxu1 %v59_v4  ;;  %v57_v6 = vld [vmem:[%s203_s3] sm:$0xff]  ;;  %s96_s10 = sshll.u32 %s139_s9, 4  ;;  %s98_s3 = sshll.u32 %s205_s5, 4  ;;  %vm89_vm3 = vcmask 17408   ;;  %s97_s10 = int_to_ptr.vmem [resolvable:$true] %s96_s10  ;;  %s99_s3 = int_to_ptr.hbm [resolvable:$true] %s98_s3 }
   0x5   :  { %108 = vmatmul.msk.f32.vlgmr.msra.gmra.mxu0 %vm28_vm1, %v21_v2  ;;  %v111_v7 = vld [vmem:[%s202_s2] ss:$0 sm:$0xff] }
   0x6   :  { %83 = vmatpush.msra.mxu1 %v58_v5  ;;  %v112_v11 = vld [vmem:[%s204_s4] ss:$0 sm:$0xff] }
   0x8   :  { %84 = vmatpush.msra.mxu1 %v57_v6 }
  0x82   :  { %v53_v8 = vpop.f32.mrf.mxu0 }
  0x83   :  { %v54_v9 = vadd.f32 %v111_v7, %v53_v8 }
  0x85   :  { %v56_v10 = vmax.f32 %v54_v9, 0.0 }
  0x87   :  { %109 = vmatmul.msk.f32.vlgmr.msra.gmra.mxu1 %vm65_vm2, %v56_v10 }
 0x104   :  { %v86_v12 = vpop.f32.mrf.mxu1 }
 0x105   :  { %v87_v13 = vadd.f32 %v112_v11, %v86_v12 }
 0x107   :  { %90 = vst.msk [vmem:[#allocation2] sm:$0x3] %vm89_vm3, %v87_v13 }
 0x108   :  { %101 = dma.vmem_to_hbm [thread:$0]  %s97_s10, 32, %s99_s3, [#allocation3]  }
 0x109   :  { %137 = dma.done.wait [#allocation3], 32  }
 0x10a   :  { %138 = vsyncadd [#allocation3], 4294967264 }
 0x10b   :  { %106 = vsyncpa [#allocation3], 1 }

</bundles_post_ra>
